<compile_context>
chip_gen: v7x
topology: tpu7x:2x2x1
jax: 0.10.0
libtpu: 0.0.40
codegen_flags: <defaults>
</compile_context>

<pallas_src>
import numpy as np
import jax
import jax.numpy as jnp
from jax import lax
from jax.experimental import pallas as pl
from jax.experimental.pallas import tpu as pltpu


def _head_kernel(x_ref, w_ref, b_ref, out_ref):
    # x_ref:   (1, t_tile, D)   VMEM (per-step tile)
    # w_ref:   (2, D)           VMEM (grid-resident)
    # b_ref:   (2, 1)  f32      VMEM (grid-resident)
    # out_ref: (1, 2, t_tile)   VMEM
    x = x_ref[0]                                   # (t_tile, D)

    # w @ x^T: contract the last (lane) dim of both operands — the same
    # dimension_numbers as the flash-attention q·kᵀ matmul, so no XLU
    # transpose of the large x tile is materialized.  Result is (2, t_tile)
    # with time on the lane axis -> one unmasked, lane-dense store.
    y = lax.dot_general(
        w_ref[...], x,
        dimension_numbers=(((1,), (1,)), ((), ())),
        preferred_element_type=jnp.float32,
    )                                              # (2, t_tile) f32

    out_ref[0] = (y + b_ref[...]).astype(out_ref.dtype)


def _pick_t_tile(B, T, D, itemsize):
    """Static tile-size heuristic (all inputs are Python ints)."""
    if T <= 512:
        # Single tile per batch row: block dims equal the full array dims,
        # so any T is legal and there is no ragged tail at all.
        return T
    # Multiple of 512 keeps both the (1, t_tile, D) input block (sublane rule)
    # and the (1, 2, t_tile) output block (lane rule) legal when T % t_tile != 0.
    target_bytes = 4 << 20                          # ~4 MiB/buffer, 8 MiB double-buffered:
    rows = (target_bytes // max(1, D * itemsize)) // 512 * 512
    t_tile = int(max(512, min(2048, rows)))         # review: 1024-2048 for long T
    # Guarantee enough grid steps to feed v7x's two TensorCores / the pipeline.
    while t_tile > 512 and B * (-(-T // t_tile)) < 4:
        t_tile -= 512
    return t_tile


def head_forward(x, weight, bias, *, t_tile=None, out_dtype=jnp.float32):
    """x: (B, T, D); weight: (2, D); bias: (2,).

    Returns {'beat': (B, T), 'downbeat': (B, T)} logits (f32 by default,
    matching a PyTorch f32 head even when x is bf16).
    """
    B, T, D = x.shape
    assert weight.shape == (2, D) and bias.shape == (2,)

    if t_tile is None:
        t_tile = _pick_t_tile(B, T, D, x.dtype.itemsize)
    num_t = pl.cdiv(T, t_tile)

    bias_col = bias.reshape(2, 1).astype(jnp.float32)
    out_isize = np.dtype(out_dtype).itemsize

    cost = pl.CostEstimate(
        flops=4 * B * T * D,                       # 2 outputs * 2 flops per MAC
        transcendentals=0,
        bytes_accessed=(B * T * D * x.dtype.itemsize          # dominant: x read
                        + 2 * B * T * out_isize               # logits write
                        + 2 * D * weight.dtype.itemsize + 2 * 4),
    )

    out = pl.pallas_call(
        _head_kernel,
        out_shape=jax.ShapeDtypeStruct((B, 2, T), out_dtype),
        grid_spec=pltpu.PrefetchScalarGridSpec(
            num_scalar_prefetch=0,
            grid=(B, num_t),
            in_specs=[
                # Per-(batch, time-tile) activation block; Pallas clips the
                # ragged last block itself (no wrapper-side padding pass).
                pl.BlockSpec((1, t_tile, D), lambda b, t: (b, t, 0)),
                # Full (2, D) weight, resident across the whole grid.
                pl.BlockSpec((2, D), lambda b, t: (0, 0)),
                # (2, 1) f32 bias column, resident across the whole grid.
                pl.BlockSpec((2, 1), lambda b, t: (0, 0)),
            ],
            out_specs=pl.BlockSpec((1, 2, t_tile), lambda b, t: (b, 0, t)),
        ),
        compiler_params=pltpu.CompilerParams(
            dimension_semantics=("parallel", "parallel"),
            # Double-buffered x tiles are capped at ~8 MiB by the heuristic;
            # 32 MiB fits comfortably on v5e (128 MiB), v6e (128 MiB) and
            # v7x (64 MiB physical) while lifting v5e's 16 MiB scoped default.
            vmem_limit_bytes=32 * 1024 * 1024,
        ),
        cost_estimate=cost,
    )(x, weight, bias_col)

    # Cheap (tiny-array) slices; the heavy rearrange was absorbed into the
    # kernel's (B, 2, T) output layout.
    return {"beat": out[:, 0, :], "downbeat": out[:, 1, :]}


if __name__ == "__main__":
    # Small shapes consistent with Head.forward: x is (batch, time, input_dim).
    B, T, D = 2, 16, 32

    key = jax.random.PRNGKey(0)
    kx, kw, kb = jax.random.split(key, 3)

    x = jax.random.normal(kx, (B, T, D), dtype=jnp.float32)
    # nn.Linear(input_dim, 2): weight (2, D), bias (2,)
    bound = 1.0 / float(np.sqrt(D))
    weight = jax.random.uniform(kw, (2, D), jnp.float32, -bound, bound)
    bias = jax.random.uniform(kb, (2,), jnp.float32, -bound, bound)

    out = head_forward(x, weight, bias)
    out = jax.block_until_ready(out)

    # Reference check against plain JAX.
    ref = x @ weight.T + bias                      # (B, T, 2)
    assert out["beat"].shape == (B, T) and out["downbeat"].shape == (B, T)
    assert jnp.allclose(out["beat"], ref[..., 0], atol=1e-5)
    assert jnp.allclose(out["downbeat"], ref[..., 1], atol=1e-5)

    print("KERNEL_OK")
</pallas_src>

<mosaic_0001>
module attributes {stable_mosaic.version = 11 : i64} {
  func.func @_head_kernel(%arg0: i32, %arg1: i32, %arg2: memref<1x16x32xf32, #tpu.memory_space<vmem>>, %arg3: memref<2x32xf32, #tpu.memory_space<vmem>>, %arg4: memref<2x1xf32, #tpu.memory_space<vmem>>, %arg5: memref<1x2x16xf32, #tpu.memory_space<vmem>>) attributes {dimension_semantics = [#tpu.dimension_semantics<parallel>, #tpu.dimension_semantics<parallel>], iteration_bounds = array<i64: 2, 1>, scalar_prefetch = 0 : i64, scratch_operands = 0 : i64, tpu.core_type = #tpu.core_type<tc>, window_params = [{transform_indices = @transform_0, window_bounds = array<i64: 1, 16, 32>}, {pipeline_mode = #tpu.pipeline_mode<synchronous>, transform_indices = @transform_1, window_bounds = array<i64: 2, 32>}, {pipeline_mode = #tpu.pipeline_mode<synchronous>, transform_indices = @transform_2, window_bounds = array<i64: 2, 1>}, {transform_indices = @transform_3, window_bounds = array<i64: 1, 2, 16>}]} {
    %c0 = arith.constant 0 : index
    %c0_0 = arith.constant 0 : index
    %c0_1 = arith.constant 0 : index
    %0 = vector.load %arg2[%c0, %c0_0, %c0_1] : memref<1x16x32xf32, #tpu.memory_space<vmem>>, vector<1x16x32xf32>
    %1 = vector.shape_cast %0 : vector<1x16x32xf32> to vector<16x32xf32>
    %c0_2 = arith.constant 0 : index
    %c0_3 = arith.constant 0 : index
    %2 = vector.load %arg3[%c0_2, %c0_3] : memref<2x32xf32, #tpu.memory_space<vmem>>, vector<2x32xf32>
    %cst = arith.constant dense<0.000000e+00> : vector<2x16xf32>
    %3 = tpu.matmul %2, %1, %cst {dimension_numbers = #tpu.dot_dimension_numbers<[1], [1], [0], [0], [0, 0, 1, 0], [], []>} : vector<2x32xf32>, vector<16x32xf32>, vector<2x16xf32> -> vector<2x16xf32>
    %c0_4 = arith.constant 0 : index
    %c0_5 = arith.constant 0 : index
    %4 = vector.load %arg4[%c0_4, %c0_5] : memref<2x1xf32, #tpu.memory_space<vmem>>, vector<2x1xf32>
    %5 = vector.broadcast %4 : vector<2x1xf32> to vector<2x16xf32>
    %6 = arith.addf %3, %5 : vector<2x16xf32>
    %c0_6 = arith.constant 0 : index
    %c0_7 = arith.constant 0 : index
    %c0_8 = arith.constant 0 : index
    %7 = vector.load %arg5[%c0_6, %c0_7, %c0_8] : memref<1x2x16xf32, #tpu.memory_space<vmem>>, vector<1x2x16xf32>
    %8 = vector.shape_cast %7 : vector<1x2x16xf32> to vector<2x16xf32>
    %9 = vector.shape_cast %6 : vector<2x16xf32> to vector<1x2x16xf32>
    tpu.vector_store %arg5[%c0_6, %c0_7, %c0_8], %9 {strides = array<i32>} : memref<1x2x16xf32, #tpu.memory_space<vmem>>, vector<1x2x16xf32>,
    return
  }
  func.func @transform_0(%arg0: i32, %arg1: i32) -> (i32, i32, i32) {
    %c0_i32 = arith.constant 0 : i32
    %c0_i32_0 = arith.constant 0 : i32
    return %arg0, %arg1, %c0_i32 : i32, i32, i32
  }
  func.func @transform_1(%arg0: i32, %arg1: i32) -> (i32, i32) {
    %c0_i32 = arith.constant 0 : i32
    %c0_i32_0 = arith.constant 0 : i32
    %c0_i32_1 = arith.constant 0 : i32
    return %c0_i32, %c0_i32_0 : i32, i32
  }
  func.func @transform_2(%arg0: i32, %arg1: i32) -> (i32, i32) {
    %c0_i32 = arith.constant 0 : i32
    %c0_i32_0 = arith.constant 0 : i32
    %c0_i32_1 = arith.constant 0 : i32
    return %c0_i32, %c0_i32_0 : i32, i32
  }
  func.func @transform_3(%arg0: i32, %arg1: i32) -> (i32, i32, i32) {
    %c0_i32 = arith.constant 0 : i32
    %c0_i32_0 = arith.constant 0 : i32
    return %arg0, %c0_i32, %arg1 : i32, i32, i32
  }
}

</mosaic_0001>

<bundles_post_ra>
// kernel: tpu_custom_call.1
= control target key start
LH: loop header
LB: loop body
LE: loop exit
PB: predicated region body
PF: predicated region fallthrough
CT: control target
= control target key end

     0   :  { %8 = vsyncpa [#allocation3], 0  ;;  %s819_s0 = inlined_call_operand.hbm [shape: f32[2,16,32], index: 0, kind: input, shape index: {}]   ;;  %s820_s1 = inlined_call_operand.vmem [shape: f32[2,32], index: 1, kind: input, shape index: {}]   ;;  %s821_s2 = inlined_call_operand.vmem [shape: f32[2,1], index: 2, kind: input, shape index: {}]   ;;  %s822_s3 = inlined_call_operand.hbm [shape: f32[2,2,16], index: 3, kind: output, shape index: {}]  }
   0x1   :  { %10 = vsyncpa [#allocation3 + $0x1], 0 }
   0x2   :  { %11 = vsyncpa [#allocation4], 0 }
   0x3   :  { %13 = vsyncpa [#allocation4 + $0x1], 0  ;;  %s639_s12 = smov 0   ;;  %s641_s13 = smov 0  }
   0x4   :  { %s643_s14 = smov 0   ;;  %s645_s15 = smov 0  }
   0x5   :  { %s647_s16 = smov 0   ;;  %s649_s17 = smov 0  }
   0x6 LB: > { %s396_s18 = sadd.s32 4294967295, %s609_s17   ;;  %s397_s19 = sadd.s32 4294967294, %s609_s17   ;;  %s609_s17 = sphi %s649_s17, %s19_s17   ;;  %s605_s16 = sphi %s647_s16, %s837_s16   ;;  %s601_s15 = sphi %s645_s15, %s836_s15   ;;  %s597_s14 = sphi %s643_s14, %s835_s14   ;;  %s593_s13 = sphi %s641_s13, %s834_s13   ;;  %s589_s12 = sphi %s639_s12, %s833_s12  }
   0x7   : > { %s31_s20 = sadd.s32 1, %s605_s16  ;;  %s40_s21 = sadd.s32 1, %s597_s14 }
   0x8   : > { %p33_p0 = scmp.ge.s32.totalorder %s31_s20, 2  ;;  %p47_p1 = scmp.ne.s32.totalorder %s597_s14, %s593_s13 }
   0x9   : > { %p48_p2 = scmp.eq.s32.totalorder %s609_s17, 0  ;;  %p53_p3 = scmp.ne.s32.totalorder %s593_s13, %s589_s12 }
   0xa   : > { %s839_s20 = smov (%p33_p0, %s31_s20), 0  ;;  %p54_p5 = scmp.eq.s32.totalorder %s396_s18, 0 }
   0xb   : > { %p680_p4 = por %p48_p2, %p47_p1  ;;  %s35_s23 = ssub.s32 %s605_s16, %s839_s20 }
   0xc   : > { %p121_p6 = scmp.eq.s32.totalorder %s396_s18, 1  ;;  %p38_p7 = scmp.eq.s32.totalorder %s35_s23, 0 }
   0xd   : > { %p686_p8 = por %p54_p5, %p53_p3  ;;  %p127_p10 = scmp.eq.s32.totalorder %s397_s19, 1 }
   0xe   : > { %p690_p9 = por %p121_p6, %p47_p1  ;;  %p440_p13 = scmp.lt.s32.totalorder %s609_s17, 2 }
   0xf   : > { %s695_s26 = scalar_select %p38_p7, %s597_s14, %s40_s21  }
  0x10   : > { %s826_s25 = scalar_select %p690_p9, 1, 0 }
  0x11   : > { %p697_p11 = por %p127_p10, %p53_p3  ;;  %s153_s28 = sand.u32 1, %s597_s14  }
  0x12   : > { %s400_s29 = sshll.u32 %s153_s28, 4  ;;  %s413_s30 = sshll.u32 %s605_s16, 8 }
  0x13   : > { %s827_s27 = scalar_select %p697_p11, 1, 0 }
  0x14   : > { %s708_s6 = scalar_lea.hbm %s819_s0, %s413_s30  ;;  %s157_s7 = scalar_lea.vmem [#allocation2], %s400_s29 }
  0x15   : > { %s166_s8 = sshll.u32 %s157_s7, 4  ;;  %p714_p0 = pnand %p440_p13, %p680_p4  ;;  %s710_s8 = int_to_ptr.vmem [resolvable:$true] %s166_s8 }
  0x16   : > { %s719_s10 = scalar_lea.sflag [#allocation3], %s153_s28  ;;  %s497_s11 = scalar_lea.hbm %s708_s6, 256 }
  0x17   : > { %p498_p2 = scmp.ne.s32.totalorder %s708_s6, %s497_s11  ;;  %p499_p3 = pneg %p714_p0 }
  0x18   : > { %s502_s21 = scalar_lea.hbm %s819_s0, 512  ;;  %p503_p4 = scmp.lt.u32.totalorder %s708_s6, %s819_s0 }
  0x19   : > { %p500_p5 = pnand %p499_p3, %p498_p2  ;;  %p504_p7 = scmp.lt.u32.totalorder %s502_s21, %s497_s11 }
  0x1a   : > { %p506_p13 = scmp.lt.u32.totalorder %s497_s11, %s708_s6 }
  0x1b   : > { %p501_p6 = pneg %p500_p5  ;;  %p505_p10 = por %p504_p7, %p503_p4 }
  0x1d   : > { %p507_p12 = por %p506_p13, %p505_p10 }
  0x1f   : > { %p508_p1 = pnand %p507_p12, %p501_p6 }
  0x21   : > { %511 = shalt.err (!%p508_p1)
}
  0x22   : > { %s512_s28 = scalar_lea.vmem %s710_s8, 256  ;;  %s611_s29 = smov [#allocation2]  }
  0x23   : > { %p513_p2 = scmp.ne.s32.totalorder %s710_s8, %s512_s28  ;;  %s517_s30 = sshll.u32 %s611_s29, 4  ;;  %s518_s30 = int_to_ptr.vmem [resolvable:$false] %s517_s30 }
  0x24   : > { %s519_s4 = scalar_lea.vmem %s518_s30, 512  ;;  %p520_p9 = scmp.lt.s32.totalorder %s710_s8, %s518_s30 }
  0x25   : > { %p515_p5 = pnand %p513_p2, %p499_p3  ;;  %p521_p4 = scmp.lt.s32.totalorder %s519_s4, %s512_s28 }
  0x27   : > { %p516_p11 = pneg %p515_p5  ;;  %p522_p7 = por %p521_p4, %p520_p9 }
  0x29   : > { %p523_p10 = pnand %p522_p7, %p516_p11 }
  0x2b   : > { %526 = shalt.err (!%p523_p10)
}
  0x2c   : > { %s612_s5 = smov 128   ;;  %s613_s7 = smov 8  }
  0x2d   : > { %435 = dma.hbm_to_vmem [thread:$0]  (!%p714_p0), %s708_s6, 256, %s710_s8, %s719_s10, %s612_s5, %s612_s5, %s613_s7  }
  0x2e   : > { %p174_p12 = scmp.lt.s32.totalorder %s609_s17, 3  ;;  %p829_p1 = scmp.ge.s32.totalorder %s609_s17, 1 }
  0x30   : > { %p175_p3 = pnand %p829_p1, %p174_p12 }
  0x31   : > { %s751_s11 = sand.u32 (!%p175_p3), 1, %s593_s13  }
  0x32   : > { %178 = sbr.rel (%p175_p3) target bundleno = 297 (0x129), region = 32  ;;  %s404_s18 = sshll.u32 (!%p175_p3), %s751_s11, 4 }
  0x33   : > { %s181_s19 = scalar_lea.sflag (!%p175_p3), [#allocation3], %s751_s11  ;;  %s184_s21 = scalar_lea.vmem (!%p175_p3), [#allocation2], %s404_s18 }
  0x39   : > { %580 = dma.done.wait (%p686_p8), %s181_s19, 256  }
  0x3a   : > { %582 = vsyncadd (%p686_p8), %s181_s19, 4294967040  ;;  %v614_v0 = vmov 0.0|0.0   ;;  %vm615_vm0 = vmmov 0   ;;  %v616_v1 = vmov 0.0   ;;  %v617_v2 = vmov 0   ;;  %v208_v3 = vld [vmem:[%s184_s21] sm:$0xff] }
  0x3b   : > { %424 = vmatprep.subr.bf16.mxu0 %v614_v0  ;;  %421 = vmatprep.mubr.msk.f32.mxu0 %vm615_vm0, %v616_v1  ;;  %vm217_vm1 = vcmask 261120   ;;  %v209_v4 = vld [vmem:[%s184_s21 + $0x8] sm:$0xff]  ;;  %v211_v6 = vld [vmem:[%s821_s2] sm:$0x3]  ;;  %s405_s10 = sshll.u32 %s751_s11, 1  ;;  %s410_s22 = sshll.u32 %s601_s15, 5 }
  0x3c   : > { %496 = vset.pattern.permute.xlu0 %v617_v2  ;;  %vm426_vm2 = vmpackc.low %vm217_vm1, %vm217_vm1  ;;  %v425_v5 = vpack.c.bf16 %v209_v4, %v208_v3  ;;  %v210_v7 = vld [vmem:[%s820_s1] sm:$0x3]  ;;  %s206_s23 = scalar_lea.vmem [#allocation5], %s405_s10  ;;  %vm297_vm3 = vcmask 123904   ;;  %s770_s4 = scalar_lea.hbm %s822_s3, %s410_s22 }
  0x3d   : > { %214 = vperm.xlu0 %496, %v211_v6   ;;  %s314_s28 = sshll.u32 %s206_s23, 4  ;;  %s300_s5 = scalar_lea.sflag [#allocation4], %s751_s11  ;;  %s772_s28 = int_to_ptr.vmem [resolvable:$true] %s314_s28 }
  0x3e   : > { %427 = vmatpush3.bf16.xpose.msk.msra.mxu0 %vm426_vm2, %v425_v5  ;;  %s527_s7 = scalar_lea.vmem %s772_s28, 32  ;;  %p830_p9 = scmp.ne.s32.totalorder %s826_s25, 0 }
  0x3f   : > { %p528_p8 = scmp.ne.s32.totalorder %s772_s28, %s527_s7  ;;  %s618_s15 = smov [#allocation5]  }
  0x40   : > { %s531_s18 = sshll.u32 %s618_s15, 4  ;;  %s532_s18 = int_to_ptr.vmem [resolvable:$false] %s531_s18 }
  0x41   : > { %p529_p11 = pnand %p528_p8, %p830_p9  ;;  %s533_s19 = scalar_lea.vmem %s532_s18, 64 }
  0x42   : > { %p534_p6 = scmp.lt.s32.totalorder %s772_s28, %s532_s18  ;;  %p535_p13 = scmp.lt.s32.totalorder %s533_s19, %s527_s7 }
  0x43   : > { %p530_p0 = pneg %p529_p11 }
  0x44   : > { %p536_p2 = por %p535_p13, %p534_p6 }
  0x45   : > { %422 = vmatmul.mubr.msk.f32.vlgmr.msra.gmra.mrb[0].mxu0 %vm217_vm1, %v210_v7 }
  0x46   : > { %p537_p5 = pnand %p536_p2, %p530_p0 }
  0xbc   : > { %v215_v8 = vpop.permute.xlu0 %214 }
 0x118   : > { %v293_v9 = vpop.f32.mrb[0].mxu0 }
 0x119   : > { %v294_v10 = vadd.f32 %v293_v9, %v215_v8  ;;  %v423_v11 = vpop.f32.mrb[1].mxu0 }
 0x11b   : > { %298 = vst.msk [vmem:[%s206_s23] sm:$0x3] %vm297_vm3, %v294_v10 }
 0x11c   : > { %540 = shalt.err (!%p537_p5)
}
 0x11d   : > { %s541_s11 = scalar_lea.hbm %s770_s4, 32  ;;  %s545_s8 = scalar_lea.hbm %s822_s3, 64 }
 0x11e   : > { %p542_p4 = scmp.ne.s32.totalorder %s770_s4, %s541_s11  ;;  %p546_p12 = scmp.lt.u32.totalorder %s770_s4, %s822_s3 }
 0x11f   : > { %p547_p1 = scmp.lt.u32.totalorder %s545_s8, %s541_s11  ;;  %p549_p8 = scmp.lt.u32.totalorder %s541_s11, %s770_s4 }
 0x120   : > { %p543_p7 = pnand %p542_p4, %p830_p9 }
 0x121   : > { %p548_p3 = por %p547_p1, %p546_p12 }
 0x122   : > { %p544_p10 = pneg %p543_p7 }
 0x123   : > { %p550_p11 = por %p549_p8, %p548_p3 }
 0x125   : > { %p551_p0 = pnand %p550_p11, %p544_p10 }
 0x127   : > { %554 = shalt.err (!%p551_p0)
}
 0x128   : > { %430 = dma.vmem_to_hbm [thread:$0]  (%p830_p9), %s772_s28, 32, %s770_s4, %s300_s5  }
 0x129 PF: > { %s326_s10 = sand.u32 1, %s589_s12   ;;  %p831_p6 = scmp.ne.s32.totalorder %s827_s27, 0 }
 0x12a   : > { %p832_p13 = scmp.ge.s32.totalorder %s609_s17, 2  ;;  %s327_s22 = scalar_lea.sflag [#allocation4], %s326_s10 }
 0x12c   : > { %p437_p2 = pnand %p832_p13, %p831_p6 }
 0x12e   : > { %584 = dma.done.wait (!%p437_p2), %s327_s22, 32  }
 0x12f   : > { %586 = vsyncadd (!%p437_p2), %s327_s22, 4294967264  ;;  %s19_s17 = sadd.s32 1, %s609_s17   ;;  %s833_s12 = smov %s593_s13 }
 0x130   : > { %p16_p5 = scmp.ge.s32.totalorder %s19_s17, 4   ;;  %s834_s13 = smov %s597_s14 }
 0x131   : > { %s835_s14 = smov %s695_s26  ;;  %s836_s15 = smov %s605_s16 }
 0x132   : > { %s837_s16 = smov %s839_s20  ;;  %18 = sbr.rel (!%p16_p5) target bundleno = 6 (0x6), region = 77 }
 0x139   :  { %332 = vsyncpa [#allocation3], 1 }
 0x13a   :  { %334 = vsyncpa [#allocation3 + $0x1], 1 }
 0x13b   :  { %335 = vsyncpa [#allocation4], 1 }
 0x13c   :  { %337 = vsyncpa [#allocation4 + $0x1], 1 }

</bundles_post_ra>
